<compile_context>
chip_gen: v6e
topology: v6e:2x2x1
jax: 0.10.0
libtpu: 0.0.40
codegen_flags: <defaults>
</compile_context>

<pallas_src>
import functools

import jax
import jax.numpy as jnp
from jax.experimental import pallas as pl
from jax.experimental.pallas import tpu as pltpu

LANE = 128     # lane width: last dim of every block is a multiple of this
SUBLANE = 8    # sublane width: batch tiles are multiples of this


def _round_up(n, m):
    return ((n + m - 1) // m) * m


def _vmem_capacity_bytes():
    try:
        return int(pltpu.get_tpu_info().vmem_capacity_bytes)
    except Exception:
        return 64 << 20   # conservative (v7x per-TC VMEM)


def _make_mlp_kernel(num_layers):
    """Fused L-layer MLP tile: h <- relu(h @ W_l + b_l), all layers in VMEM.

    refs layout: (x_ref, w0, b0, w1, b1, ..., o_ref)
      x_ref : (bm, P_in)        bf16 activation tile
      w_l   : (P_in_l, P_out_l) bf16 zero-padded weight, (in, out) layout
      b_l   : (1, P_out_l)      f32  zero-padded bias
      o_ref : (bm, P_out)       f32  final activation tile (ReLU after every
                                     layer, incl. the last — matches torch)
    """
    def kernel(*refs):
        x_ref, o_ref = refs[0], refs[-1]
        h = x_ref[...]                                         # bf16
        for l in range(num_layers):                            # static -> unrolled
            w_ref = refs[1 + 2 * l]
            b_ref = refs[2 + 2 * l]
            y = jnp.dot(h, w_ref[...],
                        preferred_element_type=jnp.float32)    # bf16 MXU, f32 acc
            y = jnp.maximum(y + b_ref[...], 0.0)               # f32 bias + ReLU (VPU)
            # keep inter-layer activation bf16; last layer stays f32 for the store
            h = y.astype(jnp.bfloat16) if l + 1 < num_layers else y
        o_ref[...] = h
    return kernel


@functools.partial(jax.jit, static_argnames=("out_size", "block_m"))
def mlp_forward(x, packed, *, out_size, block_m=512):
    """Run the fused MLP.

    x:      (batch, in_size) float array.
    packed: tuple of (w_pad bf16 (P_in_l, P_out_l), b_pad f32 (1, P_out_l))
            from pack_params().
    Returns (batch, out_size) f32.
    """
    M, in_size = x.shape
    num_layers = len(packed)
    p_in = packed[0][0].shape[0]
    p_out = packed[-1][0].shape[1]
    max_p = max(max(w.shape) for w, _ in packed)

    weight_bytes = sum(int(w.size) * w.dtype.itemsize + int(b.size) * b.dtype.itemsize
                       for w, b in packed)

    # ---- batch tiling -------------------------------------------------------
    bm = min(block_m, _round_up(M, SUBLANE))          # rows per grid step
    # v7x latency: if the grid degenerates to one step but the batch is big
    # enough and weights are cheap, split in two so both TensorCores work.
    if pl.cdiv(M, bm) == 1 and M >= 2 * SUBLANE and weight_bytes <= (2 << 20):
        bm = _round_up(pl.cdiv(M, 2), SUBLANE)
    grid = (pl.cdiv(M, bm),)                          # partial last block is masked

    # ---- input: cast to bf16, pad feature lanes only if needed --------------
    x = x.astype(jnp.bfloat16)
    if in_size != p_in:
        x = jnp.pad(x, ((0, 0), (0, p_in - in_size)))

    # ---- specs ---------------------------------------------------------------
    flat_params = []
    in_specs = [pl.BlockSpec((bm, p_in), lambda i: (i, 0))]
    for w, b in packed:
        flat_params += [w, b]
        # constant blocks -> single-buffered (halves resident weight VMEM)
        in_specs.append(pl.BlockSpec(w.shape, lambda i: (0, 0),
                                     pipeline_mode=pl.Buffered(1)))
        in_specs.append(pl.BlockSpec(b.shape, lambda i: (0, 0),
                                     pipeline_mode=pl.Buffered(1)))

    # ---- explicit VMEM budget ------------------------------------------------
    in_buf = bm * p_in * 2           # bf16, double-buffered
    out_buf = bm * p_out * 4         # f32,  double-buffered
    slack = 4 * bm * max_p * 4 + (2 << 20)   # in-flight f32 intermediates + margin
    needed = weight_bytes + 2 * in_buf + 2 * out_buf + slack
    vmem_limit = int(min(max(needed, 32 << 20), _vmem_capacity_bytes()))

    out = pl.pallas_call(
        _make_mlp_kernel(num_layers),
        out_shape=jax.ShapeDtypeStruct((M, p_out), jnp.float32),
        grid_spec=pltpu.PrefetchScalarGridSpec(
            num_scalar_prefetch=0,
            grid=grid,
            in_specs=in_specs,
            out_specs=pl.BlockSpec((bm, p_out), lambda i: (i, 0)),
        ),
        compiler_params=pltpu.CompilerParams(
            dimension_semantics=("parallel",),     # batch tiles shard across TCs
            vmem_limit_bytes=vmem_limit),
    )(x, *flat_params)

    return out[:, :out_size]


def init_mlp_params(key, num_layers, input_size, hidden_size, output_size):
    """Per-layer (w, b) with w shaped (in, out) — pre-transposed vs torch's (out, in)."""
    n_mid = max(num_layers - 2, 0)
    sizes = [(input_size, hidden_size)]
    sizes += [(hidden_size, hidden_size)] * n_mid
    sizes += [(hidden_size, output_size)]
    params = []
    for fan_in, fan_out in sizes:
        key, kw, kb = jax.random.split(key, 3)
        bound = 1.0 / (fan_in ** 0.5)  # same scale as torch.nn.Linear default init
        w = jax.random.uniform(kw, (fan_in, fan_out), jnp.float32, -bound, bound)
        b = jax.random.uniform(kb, (fan_out,), jnp.float32, -bound, bound)
        params.append((w, b))
    return params


def pack_params(params, lane=LANE):
    """One-time per-layer packing: pad each layer to lane-aligned (P_in, P_out).

    Weights -> bf16 (MXU-native, halves weight bytes); biases stay f32.
    Zero padding keeps padded lanes exactly 0 through every ReLU layer.
    (On v6e/v7x in the MXU-bound regime, lane=256 better fills the 256x256 MXU.)
    """
    packed = []
    for w, b in params:
        fi, fo = w.shape
        pi, po = _round_up(fi, lane), _round_up(fo, lane)
        wp = jnp.zeros((pi, po), jnp.bfloat16).at[:fi, :fo].set(w.astype(jnp.bfloat16))
        bp = jnp.zeros((1, po), jnp.float32).at[0, :fo].set(b)
        packed.append((wp, bp))
    return tuple(packed)


def mlp_reference(x, params):
    """Pure-JAX reference mirroring the kernel's numerics (bf16 operands/activations,
    f32 accumulate, bf16 inter-layer activations, f32 final output)."""
    h = x.astype(jnp.bfloat16)
    n = len(params)
    for l, (w, b) in enumerate(params):
        y = jnp.dot(h.astype(jnp.float32),
                    w.astype(jnp.bfloat16).astype(jnp.float32),
                    precision=jax.lax.Precision.HIGHEST) + b
        y = jnp.maximum(y, 0.0)   # ReLU on every layer, incl. last (matches torch spec)
        h = y.astype(jnp.bfloat16) if l + 1 < n else y
    return h


if __name__ == "__main__":
    num_layers, input_size, hidden_size, output_size = 3, 32, 32, 16
    batch = 8

    key = jax.random.PRNGKey(0)
    key, kx = jax.random.split(key)
    x = jax.random.normal(kx, (batch, input_size), jnp.float32)

    params = init_mlp_params(key, num_layers, input_size, hidden_size, output_size)
    packed = pack_params(params)

    out = mlp_forward(x, packed, out_size=output_size)
    out = jax.block_until_ready(out)

    ref = mlp_reference(x, params)
    assert out.shape == (batch, output_size), out.shape
    assert jnp.allclose(out, ref, atol=2e-3, rtol=2e-3), (
        "mismatch vs reference, max abs err = "
        f"{float(jnp.max(jnp.abs(out - ref)))}")

    print("KERNEL_OK")
</pallas_src>

<mosaic_0001>
module attributes {stable_mosaic.version = 11 : i64} {
  func.func @kernel(%arg0: i32, %arg1: memref<8x128xbf16, #tpu.memory_space<vmem>>, %arg2: memref<128x128xbf16, #tpu.memory_space<vmem>>, %arg3: memref<1x128xf32, #tpu.memory_space<vmem>>, %arg4: memref<128x128xbf16, #tpu.memory_space<vmem>>, %arg5: memref<1x128xf32, #tpu.memory_space<vmem>>, %arg6: memref<128x128xbf16, #tpu.memory_space<vmem>>, %arg7: memref<1x128xf32, #tpu.memory_space<vmem>>, %arg8: memref<8x128xf32, #tpu.memory_space<vmem>>) attributes {dimension_semantics = [#tpu.dimension_semantics<parallel>], iteration_bounds = array<i64: 1>, scalar_prefetch = 0 : i64, scratch_operands = 0 : i64, tpu.core_type = #tpu.core_type<tc>, window_params = [{transform_indices = @transform_0, window_bounds = array<i64: 8, 128>}, {pipeline_mode = #tpu.pipeline_mode<synchronous>, transform_indices = @transform_1, window_bounds = array<i64: 128, 128>}, {pipeline_mode = #tpu.pipeline_mode<synchronous>, transform_indices = @transform_2, window_bounds = array<i64: 1, 128>}, {pipeline_mode = #tpu.pipeline_mode<synchronous>, transform_indices = @transform_3, window_bounds = array<i64: 128, 128>}, {pipeline_mode = #tpu.pipeline_mode<synchronous>, transform_indices = @transform_4, window_bounds = array<i64: 1, 128>}, {pipeline_mode = #tpu.pipeline_mode<synchronous>, transform_indices = @transform_5, window_bounds = array<i64: 128, 128>}, {pipeline_mode = #tpu.pipeline_mode<synchronous>, transform_indices = @transform_6, window_bounds = array<i64: 1, 128>}, {transform_indices = @transform_7, window_bounds = array<i64: 8, 128>}]} {
    %c0 = arith.constant 0 : index
    %c0_0 = arith.constant 0 : index
    %0 = vector.load %arg1[%c0, %c0_0] : memref<8x128xbf16, #tpu.memory_space<vmem>>, vector<8x128xbf16>
    %c0_1 = arith.constant 0 : index
    %c0_2 = arith.constant 0 : index
    %1 = vector.load %arg2[%c0_1, %c0_2] : memref<128x128xbf16, #tpu.memory_space<vmem>>, vector<128x128xbf16>
    %cst = arith.constant dense<0.000000e+00> : vector<8x128xf32>
    %2 = tpu.matmul %0, %1, %cst {dimension_numbers = #tpu.dot_dimension_numbers<[1], [0], [0], [1], [0, 0, 1, 1], [], []>} : vector<8x128xbf16>, vector<128x128xbf16>, vector<8x128xf32> -> vector<8x128xf32>
    %c0_3 = arith.constant 0 : index
    %c0_4 = arith.constant 0 : index
    %3 = vector.load %arg3[%c0_3, %c0_4] : memref<1x128xf32, #tpu.memory_space<vmem>>, vector<1x128xf32>
    %4 = vector.broadcast %3 : vector<1x128xf32> to vector<8x128xf32>
    %5 = arith.addf %2, %4 : vector<8x128xf32>
    %cst_5 = arith.constant 0.000000e+00 : f32
    %6 = vector.broadcast %cst_5 : f32 to vector<8x128xf32>
    %7 = arith.maximumf %5, %6 : vector<8x128xf32>
    %8 = arith.truncf %7 : vector<8x128xf32> to vector<8x128xbf16>
    %c0_6 = arith.constant 0 : index
    %c0_7 = arith.constant 0 : index
    %9 = vector.load %arg4[%c0_6, %c0_7] : memref<128x128xbf16, #tpu.memory_space<vmem>>, vector<128x128xbf16>
    %cst_8 = arith.constant dense<0.000000e+00> : vector<8x128xf32>
    %10 = tpu.matmul %8, %9, %cst_8 {dimension_numbers = #tpu.dot_dimension_numbers<[1], [0], [0], [1], [0, 0, 1, 1], [], []>} : vector<8x128xbf16>, vector<128x128xbf16>, vector<8x128xf32> -> vector<8x128xf32>
    %c0_9 = arith.constant 0 : index
    %c0_10 = arith.constant 0 : index
    %11 = vector.load %arg5[%c0_9, %c0_10] : memref<1x128xf32, #tpu.memory_space<vmem>>, vector<1x128xf32>
    %12 = vector.broadcast %11 : vector<1x128xf32> to vector<8x128xf32>
    %13 = arith.addf %10, %12 : vector<8x128xf32>
    %cst_11 = arith.constant 0.000000e+00 : f32
    %14 = vector.broadcast %cst_11 : f32 to vector<8x128xf32>
    %15 = arith.maximumf %13, %14 : vector<8x128xf32>
    %16 = arith.truncf %15 : vector<8x128xf32> to vector<8x128xbf16>
    %c0_12 = arith.constant 0 : index
    %c0_13 = arith.constant 0 : index
    %17 = vector.load %arg6[%c0_12, %c0_13] : memref<128x128xbf16, #tpu.memory_space<vmem>>, vector<128x128xbf16>
    %cst_14 = arith.constant dense<0.000000e+00> : vector<8x128xf32>
    %18 = tpu.matmul %16, %17, %cst_14 {dimension_numbers = #tpu.dot_dimension_numbers<[1], [0], [0], [1], [0, 0, 1, 1], [], []>} : vector<8x128xbf16>, vector<128x128xbf16>, vector<8x128xf32> -> vector<8x128xf32>
    %c0_15 = arith.constant 0 : index
    %c0_16 = arith.constant 0 : index
    %19 = vector.load %arg7[%c0_15, %c0_16] : memref<1x128xf32, #tpu.memory_space<vmem>>, vector<1x128xf32>
    %20 = vector.broadcast %19 : vector<1x128xf32> to vector<8x128xf32>
    %21 = arith.addf %18, %20 : vector<8x128xf32>
    %cst_17 = arith.constant 0.000000e+00 : f32
    %22 = vector.broadcast %cst_17 : f32 to vector<8x128xf32>
    %23 = arith.maximumf %21, %22 : vector<8x128xf32>
    %c0_18 = arith.constant 0 : index
    %c0_19 = arith.constant 0 : index
    %24 = vector.load %arg8[%c0_18, %c0_19] : memref<8x128xf32, #tpu.memory_space<vmem>>, vector<8x128xf32>
    tpu.vector_store %arg8[%c0_18, %c0_19], %23 {strides = array<i32>} : memref<8x128xf32, #tpu.memory_space<vmem>>, vector<8x128xf32>,
    return
  }
  func.func @transform_0(%arg0: i32) -> (i32, i32) {
    %c0_i32 = arith.constant 0 : i32
    %c0_i32_0 = arith.constant 0 : i32
    return %arg0, %c0_i32 : i32, i32
  }
  func.func @transform_1(%arg0: i32) -> (i32, i32) {
    %c0_i32 = arith.constant 0 : i32
    %c0_i32_0 = arith.constant 0 : i32
    %c0_i32_1 = arith.constant 0 : i32
    return %c0_i32, %c0_i32_0 : i32, i32
  }
  func.func @transform_2(%arg0: i32) -> (i32, i32) {
    %c0_i32 = arith.constant 0 : i32
    %c0_i32_0 = arith.constant 0 : i32
    %c0_i32_1 = arith.constant 0 : i32
    return %c0_i32, %c0_i32_0 : i32, i32
  }
  func.func @transform_3(%arg0: i32) -> (i32, i32) {
    %c0_i32 = arith.constant 0 : i32
    %c0_i32_0 = arith.constant 0 : i32
    %c0_i32_1 = arith.constant 0 : i32
    return %c0_i32, %c0_i32_0 : i32, i32
  }
  func.func @transform_4(%arg0: i32) -> (i32, i32) {
    %c0_i32 = arith.constant 0 : i32
    %c0_i32_0 = arith.constant 0 : i32
    %c0_i32_1 = arith.constant 0 : i32
    return %c0_i32, %c0_i32_0 : i32, i32
  }
  func.func @transform_5(%arg0: i32) -> (i32, i32) {
    %c0_i32 = arith.constant 0 : i32
    %c0_i32_0 = arith.constant 0 : i32
    %c0_i32_1 = arith.constant 0 : i32
    return %c0_i32, %c0_i32_0 : i32, i32
  }
  func.func @transform_6(%arg0: i32) -> (i32, i32) {
    %c0_i32 = arith.constant 0 : i32
    %c0_i32_0 = arith.constant 0 : i32
    %c0_i32_1 = arith.constant 0 : i32
    return %c0_i32, %c0_i32_0 : i32, i32
  }
  func.func @transform_7(%arg0: i32) -> (i32, i32) {
    %c0_i32 = arith.constant 0 : i32
    %c0_i32_0 = arith.constant 0 : i32
    return %arg0, %c0_i32 : i32, i32
  }
}

</mosaic_0001>

<bundles_post_ra>
// kernel: mlp_forward.1
= control target key start
LH: loop header
LB: loop body
LE: loop exit
PB: predicated region body
PF: predicated region fallthrough
CT: control target
= control target key end

     0   :  { %12 = vsyncpa [#allocation3], 0  ;;  %s759_s0 = inlined_call_operand.vmem [shape: bf16[8,128], index: 0, kind: input, shape index: {}]   ;;  %s760_s1 = inlined_call_operand.hbm [shape: bf16[128,128], index: 1, kind: input, shape index: {}]   ;;  %s761_s2 = inlined_call_operand.vmem [shape: f32[1,128], index: 2, kind: input, shape index: {}]   ;;  %s762_s3 = inlined_call_operand.hbm [shape: bf16[128,128], index: 3, kind: input, shape index: {}]   ;;  %s763_s4 = inlined_call_operand.vmem [shape: f32[1,128], index: 4, kind: input, shape index: {}]   ;;  %s764_s5 = inlined_call_operand.hbm [shape: bf16[128,128], index: 5, kind: input, shape index: {}]   ;;  %s765_s6 = inlined_call_operand.vmem [shape: f32[1,128], index: 6, kind: input, shape index: {}]   ;;  %s766_s7 = inlined_call_operand.hbm [shape: f32[8,128], index: 7, kind: output, shape index: {}]  }
   0x1   :  { %13 = vsyncpa [#allocation6], 0 }
   0x2   :  { %14 = vsyncpa [#allocation4], 0  ;;  %s657_s24 = smov [#allocation5]   ;;  %s658_s26 = smov [#allocation2]  }
   0x3   :  { %s36_s25 = sshll.u32 %s657_s24, 4  ;;  %s22_s27 = sshll.u32 %s658_s26, 4  ;;  %s37_s25 = int_to_ptr.vmem [resolvable:$true] %s36_s25  ;;  %s23_s27 = int_to_ptr.vmem [resolvable:$true] %s22_s27 }
   0x4   :  { %s579_s28 = scalar_lea.vmem %s37_s25, 1024  ;;  %p584_p1 = scmp.lt.s32.totalorder %s37_s25, %s37_s25 }
   0x5   :  { %p580_p0 = scmp.ne.s32.totalorder %s37_s25, %s579_s28  ;;  %p585_p2 = scmp.lt.s32.totalorder %s579_s28, %s579_s28 }
   0x7   :  { %p586_p3 = por %p585_p2, %p584_p1 }
   0x9   :  { %p587_p4 = pnand %p586_p3, %p580_p0 }
   0xb   :  { %590 = shalt.err (!%p587_p4)
}
   0xc   :  { %s659_s29 = smov 64   ;;  %s660_s30 = smov 4  }
   0xd   :  { %42 = dma.hbm_to_vmem [thread:$0]  %s762_s3, 1024, %s37_s25, [#allocation6], %s659_s29, %s659_s29, %s660_s30  }
   0xe   :  { %s599_s10 = scalar_lea.vmem %s23_s27, 1024  ;;  %p604_p6 = scmp.lt.s32.totalorder %s23_s27, %s23_s27 }
   0xf   :  { %p600_p5 = scmp.ne.s32.totalorder %s23_s27, %s599_s10  ;;  %p605_p7 = scmp.lt.s32.totalorder %s599_s10, %s599_s10 }
  0x11   :  { %p606_p8 = por %p605_p7, %p604_p6 }
  0x13   :  { %p607_p9 = pnand %p606_p8, %p600_p5 }
  0x15   :  { %610 = shalt.err (!%p607_p9)
}
  0x16   :  { %28 = dma.hbm_to_vmem [thread:$0]  %s760_s1, 1024, %s23_s27, [#allocation3], %s659_s29, %s659_s29, %s660_s30  }
  0x17   :  { %s661_s13 = smov [#allocation7]  }
  0x18   :  { %s50_s14 = sshll.u32 %s661_s13, 4  ;;  %s51_s14 = int_to_ptr.vmem [resolvable:$true] %s50_s14 }
  0x19   :  { %s619_s15 = scalar_lea.vmem %s51_s14, 1024  ;;  %p624_p11 = scmp.lt.s32.totalorder %s51_s14, %s51_s14 }
  0x1a   :  { %p620_p10 = scmp.ne.s32.totalorder %s51_s14, %s619_s15  ;;  %p625_p12 = scmp.lt.s32.totalorder %s619_s15, %s619_s15 }
  0x1c   :  { %p626_p13 = por %p625_p12, %p624_p11 }
  0x1e   :  { %p627_p0 = pnand %p626_p13, %p620_p10 }
  0x20   :  { %630 = shalt.err (!%p627_p0)
}
  0x21   :  { %56 = dma.hbm_to_vmem [thread:$0]  %s764_s5, 1024, %s51_s14, [#allocation6], %s659_s29, %s659_s29, %s660_s30  }
  0x22   :  { %651 = dma.done.wait [#allocation3], 1024  }
  0x23   :  { %652 = vsyncadd [#allocation3], 4294966272 }
  0x24   :  { %653 = dma.done.wait [#allocation6], 2048  }
  0x25   :  { %654 = vsyncadd [#allocation6], 4294965248  ;;  %v662_v0 = vmov 0.0   ;;  %vm663_vm0 = vmmov 0   ;;  %v547_v1 = vld [vmem:[#allocation2 + $0x38] sm:$0xff]   ;;  %v548_v2 = vld [vmem:[#allocation2 + $0x30] sm:$0xff]  }
  0x26   :  { %479 = vmatprep.subr.bf16.mxu0 %v662_v0  ;;  %495 = vmatprep.mubr.msk.bf16.mxu0 %vm663_vm0, %v662_v0  ;;  %v549_v3 = vld [vmem:[#allocation2 + $0x28] sm:$0xff]   ;;  %v555_v4 = vld [vmem:[#allocation5 + $0x38] sm:$0xff]   ;;  %v550_v5 = vld [vmem:[#allocation2 + $0x20] sm:$0xff]   ;;  %s664_s21 = smov [#allocation8]  }
  0x27   :  { %499 = vmatprep.subr.bf16.mxu1 %v662_v0  ;;  %515 = vmatprep.mubr.msk.bf16.mxu1 %vm663_vm0, %v662_v0  ;;  %v556_v6 = vld [vmem:[#allocation5 + $0x30] sm:$0xff]   ;;  %v551_v7 = vld [vmem:[#allocation2 + $0x18] sm:$0xff]   ;;  %v557_v8 = vld [vmem:[#allocation5 + $0x28] sm:$0xff]   ;;  %s415_s22 = sshll.u32 %s664_s21, 4  ;;  %s416_s22 = int_to_ptr.vmem [resolvable:$true] %s415_s22 }
  0x28   :  { %480 = vmatpush3.bf16.msra.mxu0 %v547_v1  ;;  %500 = vmatpush3.bf16.msra.mxu1 %v555_v4  ;;  %v552_v9 = vld [vmem:[#allocation2 + $0x10] sm:$0xff]   ;;  %v558_v10 = vld [vmem:[#allocation5 + $0x20] sm:$0xff]   ;;  %v553_v11 = vld [vmem:[#allocation2 + $0x8] sm:$0xff]   ;;  %p636_p2 = scmp.lt.s32.totalorder %s416_s22, %s416_s22 }
  0x29   :  { %481 = vmatprep.subr.bf16.mxu0 %v662_v0  ;;  %501 = vmatprep.subr.bf16.mxu1 %v662_v0  ;;  %v559_v12 = vld [vmem:[#allocation5 + $0x18] sm:$0xff]   ;;  %v554_v13 = vld [vmem:[#allocation2] sm:$0xff]   ;;  %v560_v14 = vld [vmem:[#allocation5 + $0x10] sm:$0xff]  }
  0x2a   :  { %v69_v15 = vld [vmem:[%s759_s0] sm:$0xf]  ;;  %v561_v16 = vld [vmem:[#allocation5 + $0x8] sm:$0xff]   ;;  %v563_v18 = vld [vmem:[#allocation7 + $0x38] sm:$0xff]  }
  0x2b   :  { %v562_v17 = vld [vmem:[#allocation5] sm:$0xff]   ;;  %v564_v19 = vld [vmem:[#allocation7 + $0x30] sm:$0xff]   ;;  %v565_v20 = vld [vmem:[#allocation7 + $0x28] sm:$0xff]  }
  0x2c   :  { %482 = vmatpush3.bf16.msra.mxu0 %v548_v2  ;;  %502 = vmatpush3.bf16.msra.mxu1 %v556_v6  ;;  %v566_v21 = vld [vmem:[#allocation7 + $0x20] sm:$0xff]   ;;  %v567_v22 = vld [vmem:[#allocation7 + $0x18] sm:$0xff]   ;;  %v568_v23 = vld [vmem:[#allocation7 + $0x10] sm:$0xff]  }
  0x2d   :  { %483 = vmatprep.subr.bf16.mxu0 %v662_v0  ;;  %503 = vmatprep.subr.bf16.mxu1 %v662_v0  ;;  %v425_v24 = vld [vmem:[%s761_s2] ss:$0 sm:$0xff]  ;;  %v569_v32 = vld [vmem:[#allocation7 + $0x8] sm:$0xff]  }
  0x2e   :  { %v570_v33 = vld [vmem:[#allocation7] sm:$0xff]  }
  0x2f   :  { %v434_v34 = vld [vmem:[%s763_s4] ss:$0 sm:$0xff]  ;;  %s631_s4 = scalar_lea.vmem %s416_s22, 128 }
  0x30   :  { %484 = vmatpush3.bf16.msra.mxu0 %v549_v3  ;;  %504 = vmatpush3.bf16.msra.mxu1 %v557_v8  ;;  %v443_v42 = vld [vmem:[%s765_s6] ss:$0 sm:$0xff]  ;;  %p632_p1 = scmp.ne.s32.totalorder %s416_s22, %s631_s4  ;;  %p637_p3 = scmp.lt.s32.totalorder %s631_s4, %s631_s4 }
  0x31   :  { %485 = vmatprep.subr.bf16.mxu0 %v662_v0  ;;  %505 = vmatprep.subr.bf16.mxu1 %v662_v0 }
  0x32   :  { %p638_p4 = por %p637_p3, %p636_p2 }
  0x34   :  { %486 = vmatpush3.bf16.msra.mxu0 %v550_v5  ;;  %506 = vmatpush3.bf16.msra.mxu1 %v558_v10  ;;  %p639_p5 = pnand %p638_p4, %p632_p1 }
  0x35   :  { %487 = vmatprep.subr.bf16.mxu0 %v662_v0  ;;  %507 = vmatprep.subr.bf16.mxu1 %v662_v0 }
  0x38   :  { %488 = vmatpush3.bf16.msra.mxu0 %v551_v7  ;;  %508 = vmatpush3.bf16.msra.mxu1 %v559_v12 }
  0x39   :  { %489 = vmatprep.subr.bf16.mxu0 %v662_v0  ;;  %509 = vmatprep.subr.bf16.mxu1 %v662_v0 }
  0x3c   :  { %490 = vmatpush3.bf16.msra.mxu0 %v552_v9  ;;  %510 = vmatpush3.bf16.msra.mxu1 %v560_v14 }
  0x3d   :  { %491 = vmatprep.subr.bf16.mxu0 %v662_v0  ;;  %511 = vmatprep.subr.bf16.mxu1 %v662_v0 }
  0x40   :  { %492 = vmatpush3.bf16.msra.mxu0 %v553_v11  ;;  %512 = vmatpush3.bf16.msra.mxu1 %v561_v16 }
  0x41   :  { %493 = vmatprep.subr.bf16.mxu0 %v662_v0  ;;  %513 = vmatprep.subr.bf16.mxu1 %v662_v0 }
  0x44   :  { %494 = vmatpush3.bf16.msra.mxu0 %v554_v13  ;;  %514 = vmatpush3.bf16.msra.mxu1 %v562_v17 }
  0x45   :  { %519 = vmatprep.subr.bf16.mxu0 %v662_v0 }
  0x47   :  { %496 = vmatmul.mubr.bf16.vlgmr.msra.gmra.mxu0 %v69_v15 }
  0x48   :  { %535 = vmatprep.mubr.msk.bf16.mxu0 %vm663_vm0, %v662_v0  ;;  %520 = vmatpush3.bf16.msra.mxu0 %v563_v18 }
  0x49   :  { %521 = vmatprep.subr.bf16.mxu0 %v662_v0 }
  0x4c   :  { %522 = vmatpush3.bf16.msra.mxu0 %v564_v19 }
  0x4d   :  { %523 = vmatprep.subr.bf16.mxu0 %v662_v0 }
  0x50   :  { %524 = vmatpush3.bf16.msra.mxu0 %v565_v20 }
  0x51   :  { %525 = vmatprep.subr.bf16.mxu0 %v662_v0 }
  0x54   :  { %526 = vmatpush3.bf16.msra.mxu0 %v566_v21 }
  0x55   :  { %527 = vmatprep.subr.bf16.mxu0 %v662_v0 }
  0x58   :  { %528 = vmatpush3.bf16.msra.mxu0 %v567_v22 }
  0x59   :  { %529 = vmatprep.subr.bf16.mxu0 %v662_v0 }
  0x5c   :  { %530 = vmatpush3.bf16.msra.mxu0 %v568_v23 }
  0x5d   :  { %531 = vmatprep.subr.bf16.mxu0 %v662_v0 }
  0x60   :  { %532 = vmatpush3.bf16.msra.mxu0 %v569_v32 }
  0x61   :  { %533 = vmatprep.subr.bf16.mxu0 %v662_v0 }
  0x64   :  { %534 = vmatpush3.bf16.msra.mxu0 %v570_v33 }
 0x107   :  { %v175_v25 = vpop.f32.mrf.mxu0 }
 0x108   :  { %v176_v26 = vadd.f32 %v425_v24, %v175_v25 }
 0x109   :  { %v497_v27 = vpop.f32.mrf.mxu0 }
 0x10a   :  { %v181_v28 = vmax.f32 %v176_v26, 0.0 }
 0x10b   :  { %v178_v29 = vpop.f32.mrf.mxu0 }
 0x10c   :  { %v182_v30 = vpack.c.bf16 %v181_v28, %v181_v28 }
 0x10d   :  { %v498_v31 = vpop.f32.mrf.mxu0 }
 0x10e   :  { %516 = vmatmul.mubr.bf16.vlgmr.msra.gmra.mxu1 %v182_v30 }
 0x1ce   :  { %v288_v35 = vpop.f32.mrf.mxu1 }
 0x1cf   :  { %v289_v36 = vadd.f32 %v434_v34, %v288_v35 }
 0x1d0   :  { %v517_v37 = vpop.f32.mrf.mxu1 }
 0x1d1   :  { %v294_v38 = vmax.f32 %v289_v36, 0.0 }
 0x1d2   :  { %v291_v39 = vpop.f32.mrf.mxu1 }
 0x1d3   :  { %v295_v40 = vpack.c.bf16 %v294_v38, %v294_v38 }
 0x1d4   :  { %v518_v41 = vpop.f32.mrf.mxu1 }
 0x1d5   :  { %536 = vmatmul.mubr.bf16.vlgmr.msra.gmra.mxu0 %v295_v40 }
 0x295   :  { %v401_v43 = vpop.f32.mrf.mxu0 }
 0x296   :  { %v402_v44 = vadd.f32 %v443_v42, %v401_v43 }
 0x297   :  { %v537_v45 = vpop.f32.mrf.mxu0 }
 0x298   :  { %v407_v46 = vmax.f32 %v402_v44, 0.0 }
 0x299   :  { %v404_v47 = vpop.f32.mrf.mxu0 }
 0x29a   :  { %408 = vst [vmem:[#allocation8] sm:$0xff] %v407_v46 }
 0x29b   :  { %v538_v48 = vpop.f32.mrf.mxu0 }
 0x29c   :  { %642 = shalt.err (!%p639_p5)
}
 0x29d   :  { %418 = dma.vmem_to_hbm [thread:$0]  %s416_s22, 128, %s766_s7, [#allocation4]  }
 0x29e   :  { %655 = dma.done.wait [#allocation4], 128  }
 0x29f   :  { %656 = vsyncadd [#allocation4], 4294967168 }
 0x2a0   :  { %422 = vsyncpa [#allocation3], 1 }
 0x2a1   :  { %423 = vsyncpa [#allocation6], 1 }
 0x2a2   :  { %424 = vsyncpa [#allocation4], 1 }

</bundles_post_ra>
